<compile_context>
chip_gen: v7x
topology: tpu7x:2x2x1
jax: 0.10.0
libtpu: 0.0.40
codegen_flags: <defaults>
</compile_context>

<pallas_src>
import jax
import jax.numpy as jnp
from jax.experimental import pallas as pl
from jax.experimental.pallas import tpu as pltpu


# --------------------------------------------------------------------------------------
# Kernel: per-node scores.
#   neigh[n] = (1/deg[n]) * sum_u adj[n, u] * feat[u]          (mean aggregation)
#   x[n]     = relu(feat[n] @ w_self + neigh[n] @ w_neigh + b_conv)
#   s[n]     = [ x[n] @ w_src + b_pred ,  x[n] @ w_dst ]       (prediction head per node)
# Grid: (dst-node row tiles  -> "parallel",  src-node K tiles -> "arbitrary").
# --------------------------------------------------------------------------------------
def _node_scores_kernel(adj_ref, feat_k_ref, feat_i_ref, dinv_ref,
                        w_self_ref, w_neigh_ref, b_conv_ref, w_edge_ref, b_edge_ref,
                        s_ref, acc_ref):
    k = pl.program_id(1)

    @pl.when(k == 0)
    def _():
        acc_ref[...] = jnp.zeros_like(acc_ref)

    # Stream one (tn, tk) adjacency tile against the matching (tk, F) feature tile.
    acc_ref[...] += jnp.dot(adj_ref[...], feat_k_ref[...],
                            preferred_element_type=jnp.float32)              # [tn, F] f32

    @pl.when(k == pl.num_programs(1) - 1)
    def _():
        # Mean normalization applied in f32 after the exact 0/1 adjacency matmul.
        neigh = (acc_ref[...] * dinv_ref[...]).astype(jnp.bfloat16)          # [tn, F]
        h = (jnp.dot(feat_i_ref[...], w_self_ref[...],
                     preferred_element_type=jnp.float32)
             + jnp.dot(neigh, w_neigh_ref[...],
                       preferred_element_type=jnp.float32)
             + b_conv_ref[...])                                              # [tn, H] f32
        x = jnp.maximum(h, 0.0).astype(jnp.bfloat16)                         # relu
        # Per-node prediction head: col 0 = x @ w_src + b_pred, col 1 = x @ w_dst.
        s_ref[...] = (jnp.dot(x, w_edge_ref[...],
                              preferred_element_type=jnp.float32)
                      + b_edge_ref[...])                                     # [tn, 2] f32


# --------------------------------------------------------------------------------------
# One-time parameter repacking (not per-call work).
# --------------------------------------------------------------------------------------
def prepare_params(w_self, w_neigh, b_conv, w_pred, b_pred):
    H = w_self.shape[1]
    w_edge = jnp.concatenate([w_pred[:H, :], w_pred[H:, :]], axis=1).astype(jnp.bfloat16)  # [H, 2]
    b_edge = jnp.concatenate([b_pred.reshape(1, 1).astype(jnp.float32),
                              jnp.zeros((1, 1), jnp.float32)], axis=1)                      # [1, 2]
    return (w_self.astype(jnp.bfloat16),
            w_neigh.astype(jnp.bfloat16),
            b_conv.reshape(1, -1).astype(jnp.float32),
            w_edge,
            b_edge)


def _round_up(x, m):
    return ((x + m - 1) // m) * m


def _pick_tile(total, preferred, align, *, want_two_steps=False):
    """Largest multiple of `align` that divides `total` (a multiple of align) and <= preferred."""
    t = min(preferred, total)
    t -= t % align
    t = max(t, align)
    while total % t:
        t -= align
    if want_two_steps and total // t < 2 and total >= 2 * align:
        half = total // 2
        half -= half % align
        while half >= align and total % half:
            half -= align
        if half >= align:
            t = half   # give both v7x TensorCores a row tile
    return t


def _vmem_limit_bytes():
    try:
        cap = pltpu.get_tpu_info().vmem_capacity_bytes
    except Exception:
        cap = 64 * 1024 * 1024      # conservative (v7x-sized) fallback
    # ~75% of physical, capped: v5e/v6e (128 MiB) -> 96 MiB, v7x (64 MiB) -> 48 MiB.
    return int(min(cap * 3 // 4, 96 * 1024 * 1024))


def graphsage_link_predict(adj_counts, feats, src_ids, dst_ids, params,
                           *, node_tile=512, k_tile=512):
    """adj_counts: dense dst-major adjacency counts f32 [N, N] (adj[v, u] = #edges u -> v).
       feats: node features f32 [N, F].  src_ids / dst_ids: int32 with E elements."""
    w_self, w_neigh, b_conv, w_edge, b_edge = params
    N, F = feats.shape
    H = w_self.shape[1]
    src = src_ids.reshape(-1).astype(jnp.int32)
    dst = dst_ids.reshape(-1).astype(jnp.int32)

    # Mean normalization kept in f32; adjacency stays exact (0/1/count) in bf16.
    deg = jnp.sum(adj_counts, axis=1, keepdims=True)
    deg_inv = jnp.where(deg > 0, 1.0 / jnp.maximum(deg, 1.0), 0.0).astype(jnp.float32)

    # Pad the node dimension so every block is 128-aligned (padded rows/cols are zero
    # and padded nodes are never gathered).
    N_pad = _round_up(N, 128)
    adj_bf = jnp.pad(adj_counts, ((0, N_pad - N), (0, N_pad - N))).astype(jnp.bfloat16)
    feat_bf = jnp.pad(feats, ((0, N_pad - N), (0, 0))).astype(jnp.bfloat16)
    dinv = jnp.pad(deg_inv, ((0, N_pad - N), (0, 0)))

    tn = _pick_tile(N_pad, node_tile, 128, want_two_steps=True)   # dst-node row tile
    tk = _pick_tile(N_pad, k_tile, 128)                           # src-node (K) tile

    cparams = pltpu.CompilerParams(
        dimension_semantics=("parallel", "arbitrary"),
        vmem_limit_bytes=_vmem_limit_bytes())

    scores = pl.pallas_call(
        _node_scores_kernel,
        out_shape=jax.ShapeDtypeStruct((N_pad, 2), jnp.float32),
        grid=(N_pad // tn, N_pad // tk),
        in_specs=[
            pl.BlockSpec((tn, tk), lambda i, k: (i, k)),     # adjacency tile (bf16, exact 0/1)
            pl.BlockSpec((tk, F), lambda i, k: (k, 0)),      # source-node features (K tile)
            pl.BlockSpec((tn, F), lambda i, k: (i, 0)),      # this tile's own features
            pl.BlockSpec((tn, 1), lambda i, k: (i, 0)),      # deg_inv (f32)
            pl.BlockSpec((F, H), lambda i, k: (0, 0)),       # w_self
            pl.BlockSpec((F, H), lambda i, k: (0, 0)),       # w_neigh
            pl.BlockSpec((1, H), lambda i, k: (0, 0)),       # SAGEConv bias
            pl.BlockSpec((H, 2), lambda i, k: (0, 0)),       # [w_src | w_dst]
            pl.BlockSpec((1, 2), lambda i, k: (0, 0)),       # [b_pred, 0]
        ],
        out_specs=pl.BlockSpec((tn, 2), lambda i, k: (i, 0)),
        scratch_shapes=[pltpu.VMEM((tn, F), jnp.float32)],   # neighbor-sum accumulator
        compiler_params=cparams,
    )(adj_bf, feat_bf, feat_bf, dinv, w_self, w_neigh, b_conv, w_edge, b_edge)

    # Per-edge step: logit[e] = s[src[e],0] + s[dst[e],1]  (b_pred already folded into col 0).
    # This is a true O(E) gather of a tiny [N, 2] table; per the perf review it is left to
    # plain XLA instead of the former O(N*E) one-hot Pallas kernel.
    return jax.nn.sigmoid(scores[src, 0] + scores[dst, 1])   # shape (E,), matches .squeeze(1)


if __name__ == "__main__":
    # ----- small deterministic problem -----
    N, E = 16, 32
    in_feats, hidden_size, out_feats = 8, 32, 16   # hidden_size unused by the forward pass

    key = jax.random.PRNGKey(0)
    k_feat, k_src, k_dst, k_ws, k_wn, k_bc, k_wp, k_bp = jax.random.split(key, 8)

    feats = jax.random.normal(k_feat, (N, in_feats), dtype=jnp.float32)
    src = jax.random.randint(k_src, (E,), 0, N, dtype=jnp.int32)
    dst = jax.random.randint(k_dst, (E,), 0, N, dtype=jnp.int32)

    # dense adjacency (dst-major): adj[v, u] counts edges u -> v
    adj = jnp.zeros((N, N), jnp.float32).at[dst, src].add(1.0)

    # ----- deterministic synthetic parameters (shapes from the module __init__) -----
    w_self = 0.1 * jax.random.normal(k_ws, (in_feats, out_feats), dtype=jnp.float32)
    w_neigh = 0.1 * jax.random.normal(k_wn, (in_feats, out_feats), dtype=jnp.float32)
    b_conv = 0.1 * jax.random.normal(k_bc, (1, out_feats), dtype=jnp.float32)
    w_pred = 0.1 * jax.random.normal(k_wp, (2 * out_feats, 1), dtype=jnp.float32)
    b_pred = 0.1 * jax.random.normal(k_bp, (1, 1), dtype=jnp.float32)

    params = prepare_params(w_self, w_neigh, b_conv, w_pred, b_pred)

    # ----- run the Pallas kernel path -----
    out = graphsage_link_predict(adj, feats, src, dst, params)
    out = jax.block_until_ready(out)

    # ----- reference 1: same math as the kernel (bf16 MXU operands, f32 accumulation) -----
    w_self_bf, w_neigh_bf, b_conv_f, w_edge_bf, b_edge_f = params
    deg = jnp.sum(adj, axis=1, keepdims=True)
    deg_inv = jnp.where(deg > 0, 1.0 / jnp.maximum(deg, 1.0), 0.0)
    adj_bf = adj.astype(jnp.bfloat16)
    feat_bf = feats.astype(jnp.bfloat16)
    neigh = jnp.dot(adj_bf, feat_bf, preferred_element_type=jnp.float32) * deg_inv
    h = (jnp.dot(feat_bf, w_self_bf, preferred_element_type=jnp.float32)
         + jnp.dot(neigh.astype(jnp.bfloat16), w_neigh_bf, preferred_element_type=jnp.float32)
         + b_conv_f)
    x = jnp.maximum(h, 0.0)
    s = (jnp.dot(x.astype(jnp.bfloat16), w_edge_bf, preferred_element_type=jnp.float32)
         + b_edge_f)
    ref_bf16 = jax.nn.sigmoid(s[src, 0] + s[dst, 1])

    # ----- reference 2: pure-f32 forward of the original PyTorch module -----
    neigh_f = (adj @ feats) * deg_inv
    x_f = jnp.maximum(feats @ w_self + neigh_f @ w_neigh + b_conv, 0.0)
    e_f = jnp.concatenate([x_f[src], x_f[dst]], axis=1)
    ref_f32 = jax.nn.sigmoid((e_f @ w_pred + b_pred)[:, 0])

    assert out.shape == (E,)
    assert jnp.allclose(out, ref_bf16, atol=1e-3, rtol=1e-3), (out, ref_bf16)
    assert jnp.allclose(out, ref_f32, atol=2e-2), (out, ref_f32)   # bf16-cast tolerance
    print("KERNEL_OK")
</pallas_src>

<mosaic_0001>
module attributes {stable_mosaic.version = 11 : i64} {
  func.func @_node_scores_kernel(%arg0: i32, %arg1: i32, %arg2: memref<128x128xbf16, #tpu.memory_space<vmem>>, %arg3: memref<128x8xbf16, #tpu.memory_space<vmem>>, %arg4: memref<128x8xbf16, #tpu.memory_space<vmem>>, %arg5: memref<128x1xf32, #tpu.memory_space<vmem>>, %arg6: memref<8x16xbf16, #tpu.memory_space<vmem>>, %arg7: memref<8x16xbf16, #tpu.memory_space<vmem>>, %arg8: memref<1x16xf32, #tpu.memory_space<vmem>>, %arg9: memref<16x2xbf16, #tpu.memory_space<vmem>>, %arg10: memref<1x2xf32, #tpu.memory_space<vmem>>, %arg11: memref<128x2xf32, #tpu.memory_space<vmem>>, %arg12: memref<128x8xf32, #tpu.memory_space<vmem>>) attributes {dimension_semantics = [#tpu.dimension_semantics<parallel>, #tpu.dimension_semantics<arbitrary>], iteration_bounds = array<i64: 1, 1>, scalar_prefetch = 0 : i64, scratch_operands = 1 : i64, tpu.core_type = #tpu.core_type<tc>, window_params = [{transform_indices = @transform_0, window_bounds = array<i64: 128, 128>}, {transform_indices = @transform_1, window_bounds = array<i64: 128, 8>}, {transform_indices = @transform_2, window_bounds = array<i64: 128, 8>}, {transform_indices = @transform_3, window_bounds = array<i64: 128, 1>}, {pipeline_mode = #tpu.pipeline_mode<synchronous>, transform_indices = @transform_4, window_bounds = array<i64: 8, 16>}, {pipeline_mode = #tpu.pipeline_mode<synchronous>, transform_indices = @transform_5, window_bounds = array<i64: 8, 16>}, {pipeline_mode = #tpu.pipeline_mode<synchronous>, transform_indices = @transform_6, window_bounds = array<i64: 1, 16>}, {pipeline_mode = #tpu.pipeline_mode<synchronous>, transform_indices = @transform_7, window_bounds = array<i64: 16, 2>}, {pipeline_mode = #tpu.pipeline_mode<synchronous>, transform_indices = @transform_8, window_bounds = array<i64: 1, 2>}, {transform_indices = @transform_9, window_bounds = array<i64: 128, 2>}]} {
    %c0_i32 = arith.constant 0 : i32
    %0 = arith.cmpi eq, %arg1, %c0_i32 : i32
    %1 = arith.extui %0 : i1 to i32
    %c0_i32_0 = arith.constant 0 : i32
    %2 = arith.cmpi ne, %1, %c0_i32_0 : i32
    scf.if %2 {
      %cst_10 = arith.constant 0.000000e+00 : f32
      %12 = vector.broadcast %cst_10 : f32 to vector<128x8xf32>
      %c0_11 = arith.constant 0 : index
      %c0_12 = arith.constant 0 : index
      %13 = vector.load %arg12[%c0_11, %c0_12] : memref<128x8xf32, #tpu.memory_space<vmem>>, vector<128x8xf32>
      tpu.vector_store %arg12[%c0_11, %c0_12], %12 {strides = array<i32>} : memref<128x8xf32, #tpu.memory_space<vmem>>, vector<128x8xf32>,
    } else {
    }
    %c0 = arith.constant 0 : index
    %c0_1 = arith.constant 0 : index
    %3 = vector.load %arg12[%c0, %c0_1] : memref<128x8xf32, #tpu.memory_space<vmem>>, vector<128x8xf32>
    %c0_2 = arith.constant 0 : index
    %c0_3 = arith.constant 0 : index
    %4 = vector.load %arg2[%c0_2, %c0_3] : memref<128x128xbf16, #tpu.memory_space<vmem>>, vector<128x128xbf16>
    %c0_4 = arith.constant 0 : index
    %c0_5 = arith.constant 0 : index
    %5 = vector.load %arg3[%c0_4, %c0_5] : memref<128x8xbf16, #tpu.memory_space<vmem>>, vector<128x8xbf16>
    %cst = arith.constant dense<0.000000e+00> : vector<128x8xf32>
    %6 = tpu.matmul %4, %5, %cst {dimension_numbers = #tpu.dot_dimension_numbers<[1], [0], [0], [1], [0, 0, 1, 1], [], []>} : vector<128x128xbf16>, vector<128x8xbf16>, vector<128x8xf32> -> vector<128x8xf32>
    %7 = arith.addf %3, %6 : vector<128x8xf32>
    %c0_6 = arith.constant 0 : index
    %c0_7 = arith.constant 0 : index
    %8 = vector.load %arg12[%c0_6, %c0_7] : memref<128x8xf32, #tpu.memory_space<vmem>>, vector<128x8xf32>
    tpu.vector_store %arg12[%c0_6, %c0_7], %7 {strides = array<i32>} : memref<128x8xf32, #tpu.memory_space<vmem>>, vector<128x8xf32>,
    %c0_i32_8 = arith.constant 0 : i32
    %9 = arith.cmpi eq, %arg1, %c0_i32_8 : i32
    %10 = arith.extui %9 : i1 to i32
    %c0_i32_9 = arith.constant 0 : i32
    %11 = arith.cmpi ne, %10, %c0_i32_9 : i32
    scf.if %11 {
      %c0_10 = arith.constant 0 : index
      %c0_11 = arith.constant 0 : index
      %12 = vector.load %arg12[%c0_10, %c0_11] : memref<128x8xf32, #tpu.memory_space<vmem>>, vector<128x8xf32>
      %c0_12 = arith.constant 0 : index
      %c0_13 = arith.constant 0 : index
      %13 = vector.load %arg5[%c0_12, %c0_13] : memref<128x1xf32, #tpu.memory_space<vmem>>, vector<128x1xf32>
      %14 = vector.broadcast %13 : vector<128x1xf32> to vector<128x8xf32>
      %15 = arith.mulf %12, %14 : vector<128x8xf32>
      %16 = arith.truncf %15 : vector<128x8xf32> to vector<128x8xbf16>
      %c0_14 = arith.constant 0 : index
      %c0_15 = arith.constant 0 : index
      %17 = vector.load %arg4[%c0_14, %c0_15] : memref<128x8xbf16, #tpu.memory_space<vmem>>, vector<128x8xbf16>
      %c0_16 = arith.constant 0 : index
      %c0_17 = arith.constant 0 : index
      %18 = vector.load %arg6[%c0_16, %c0_17] : memref<8x16xbf16, #tpu.memory_space<vmem>>, vector<8x16xbf16>
      %cst_18 = arith.constant dense<0.000000e+00> : vector<128x16xf32>
      %19 = tpu.matmul %17, %18, %cst_18 {dimension_numbers = #tpu.dot_dimension_numbers<[1], [0], [0], [1], [0, 0, 1, 1], [], []>} : vector<128x8xbf16>, vector<8x16xbf16>, vector<128x16xf32> -> vector<128x16xf32>
      %c0_19 = arith.constant 0 : index
      %c0_20 = arith.constant 0 : index
      %20 = vector.load %arg7[%c0_19, %c0_20] : memref<8x16xbf16, #tpu.memory_space<vmem>>, vector<8x16xbf16>
      %cst_21 = arith.constant dense<0.000000e+00> : vector<128x16xf32>
      %21 = tpu.matmul %16, %20, %cst_21 {dimension_numbers = #tpu.dot_dimension_numbers<[1], [0], [0], [1], [0, 0, 1, 1], [], []>} : vector<128x8xbf16>, vector<8x16xbf16>, vector<128x16xf32> -> vector<128x16xf32>
      %22 = arith.addf %19, %21 : vector<128x16xf32>
      %c0_22 = arith.constant 0 : index
      %c0_23 = arith.constant 0 : index
      %23 = vector.load %arg8[%c0_22, %c0_23] : memref<1x16xf32, #tpu.memory_space<vmem>>, vector<1x16xf32>
      %24 = vector.broadcast %23 : vector<1x16xf32> to vector<128x16xf32>
      %25 = arith.addf %22, %24 : vector<128x16xf32>
      %cst_24 = arith.constant 0.000000e+00 : f32
      %26 = vector.broadcast %cst_24 : f32 to vector<128x16xf32>
      %27 = arith.maximumf %25, %26 : vector<128x16xf32>
      %28 = arith.truncf %27 : vector<128x16xf32> to vector<128x16xbf16>
      %c0_25 = arith.constant 0 : index
      %c0_26 = arith.constant 0 : index
      %29 = vector.load %arg9[%c0_25, %c0_26] : memref<16x2xbf16, #tpu.memory_space<vmem>>, vector<16x2xbf16>
      %cst_27 = arith.constant dense<0.000000e+00> : vector<128x2xf32>
      %30 = tpu.matmul %28, %29, %cst_27 {dimension_numbers = #tpu.dot_dimension_numbers<[1], [0], [0], [1], [0, 0, 1, 1], [], []>} : vector<128x16xbf16>, vector<16x2xbf16>, vector<128x2xf32> -> vector<128x2xf32>
      %c0_28 = arith.constant 0 : index
      %c0_29 = arith.constant 0 : index
      %31 = vector.load %arg10[%c0_28, %c0_29] : memref<1x2xf32, #tpu.memory_space<vmem>>, vector<1x2xf32>
      %32 = vector.broadcast %31 : vector<1x2xf32> to vector<128x2xf32>
      %33 = arith.addf %30, %32 : vector<128x2xf32>
      %c0_30 = arith.constant 0 : index
      %c0_31 = arith.constant 0 : index
      %34 = vector.load %arg11[%c0_30, %c0_31] : memref<128x2xf32, #tpu.memory_space<vmem>>, vector<128x2xf32>
      tpu.vector_store %arg11[%c0_30, %c0_31], %33 {strides = array<i32>} : memref<128x2xf32, #tpu.memory_space<vmem>>, vector<128x2xf32>,
    } else {
    }
    return
  }
  func.func @transform_0(%arg0: i32, %arg1: i32) -> (i32, i32) {
    %c0_i32 = arith.constant 0 : i32
    return %arg0, %arg1 : i32, i32
  }
  func.func @transform_1(%arg0: i32, %arg1: i32) -> (i32, i32) {
    %c0_i32 = arith.constant 0 : i32
    %c0_i32_0 = arith.constant 0 : i32
    return %arg1, %c0_i32 : i32, i32
  }
  func.func @transform_2(%arg0: i32, %arg1: i32) -> (i32, i32) {
    %c0_i32 = arith.constant 0 : i32
    %c0_i32_0 = arith.constant 0 : i32
    return %arg0, %c0_i32 : i32, i32
  }
  func.func @transform_3(%arg0: i32, %arg1: i32) -> (i32, i32) {
    %c0_i32 = arith.constant 0 : i32
    %c0_i32_0 = arith.constant 0 : i32
    return %arg0, %c0_i32 : i32, i32
  }
  func.func @transform_4(%arg0: i32, %arg1: i32) -> (i32, i32) {
    %c0_i32 = arith.constant 0 : i32
    %c0_i32_0 = arith.constant 0 : i32
    %c0_i32_1 = arith.constant 0 : i32
    return %c0_i32, %c0_i32_0 : i32, i32
  }
  func.func @transform_5(%arg0: i32, %arg1: i32) -> (i32, i32) {
    %c0_i32 = arith.constant 0 : i32
    %c0_i32_0 = arith.constant 0 : i32
    %c0_i32_1 = arith.constant 0 : i32
    return %c0_i32, %c0_i32_0 : i32, i32
  }
  func.func @transform_6(%arg0: i32, %arg1: i32) -> (i32, i32) {
    %c0_i32 = arith.constant 0 : i32
    %c0_i32_0 = arith.constant 0 : i32
    %c0_i32_1 = arith.constant 0 : i32
    return %c0_i32, %c0_i32_0 : i32, i32
  }
  func.func @transform_7(%arg0: i32, %arg1: i32) -> (i32, i32) {
    %c0_i32 = arith.constant 0 : i32
    %c0_i32_0 = arith.constant 0 : i32
    %c0_i32_1 = arith.constant 0 : i32
    return %c0_i32, %c0_i32_0 : i32, i32
  }
  func.func @transform_8(%arg0: i32, %arg1: i32) -> (i32, i32) {
    %c0_i32 = arith.constant 0 : i32
    %c0_i32_0 = arith.constant 0 : i32
    %c0_i32_1 = arith.constant 0 : i32
    return %c0_i32, %c0_i32_0 : i32, i32
  }
  func.func @transform_9(%arg0: i32, %arg1: i32) -> (i32, i32) {
    %c0_i32 = arith.constant 0 : i32
    %c0_i32_0 = arith.constant 0 : i32
    return %arg0, %c0_i32 : i32, i32
  }
}

</mosaic_0001>

<bundles_post_ra>
// kernel: tpu_custom_call.1
= control target key start
LH: loop header
LB: loop body
LE: loop exit
PB: predicated region body
PF: predicated region fallthrough
CT: control target
= control target key end

     0   :  { %v1208_v1 = vmov 0   ;;  %vm37_vm0 = vcmask 64512   ;;  %v1209_v22 = vmov 0.0   ;;  %vm509_vm1 = vcmask 1043456   ;;  %s1524_s1 = inlined_call_operand.vmem [shape: bf16[128,8], index: 1, kind: input, shape index: {}]   ;;  %s1525_s0 = inlined_call_operand.vmem [shape: bf16[128,128], index: 0, kind: input, shape index: {}]   ;;  %s1526_s3 = inlined_call_operand.vmem [shape: f32[128,1], index: 3, kind: input, shape index: {}]   ;;  %s1527_s5 = inlined_call_operand.vmem [shape: bf16[8,16], index: 5, kind: input, shape index: {}]   ;;  %s1528_s4 = inlined_call_operand.vmem [shape: bf16[8,16], index: 4, kind: input, shape index: {}]   ;;  %s1529_s2 = inlined_call_operand.vmem [shape: bf16[128,8], index: 2, kind: input, shape index: {}]   ;;  %s1530_s7 = inlined_call_operand.vmem [shape: bf16[16,2], index: 7, kind: input, shape index: {}]   ;;  %s1531_s6 = inlined_call_operand.vmem [shape: f32[1,16], index: 6, kind: input, shape index: {}]   ;;  %s1532_s8 = inlined_call_operand.vmem [shape: f32[1,2], index: 8, kind: input, shape index: {}]   ;;  %s1533_s9 = inlined_call_operand.vmem [shape: f32[128,2], index: 9, kind: output, shape index: {}]  }
   0x1   :  { %v1183_v0 = vld [vmem:[%s1524_s1] sm:$0xff]   ;;  %1181 = vset.pattern.permute.xlu0 %v1208_v1  ;;  %1182 = vset.pattern.permute.xlu1 %v1208_v1  ;;  %v1184_v2 = vld [vmem:[%s1524_s1 + $0x8] sm:$0xff]   ;;  %v1185_v3 = vld [vmem:[%s1524_s1 + $0x10] sm:$0xff]   ;;  %40 = vst.msk [vmem:[#allocation2 + $0x10] sm:$0xff] %vm37_vm0, %v1209_v22  ;;  %vm836_vm2 = vcmask 130048   ;;  %vm958_vm3 = vcmask 15360  }
   0x2   :  { %1073 = vmatprep.subr.bf16.mxu0 %v1183_v0  ;;  %v1186_v4 = vld [vmem:[%s1524_s1 + $0x18] sm:$0xff]   ;;  %v1191_v5 = vld [vmem:[%s1525_s0] sm:$0xff]   ;;  %v1188_v7 = vld [vmem:[%s1524_s1 + $0x28] sm:$0xff]   ;;  %38 = vst.msk [vmem:[#allocation2] sm:$0xff] %vm37_vm0, %v1209_v22 }
   0x3   :  { %1074 = vmatpush3.bf16.msra.mxu0 %v1183_v0  ;;  %1089 = vmatprep.mubr.bf16.mxu0 %v1191_v5  ;;  %v1187_v6 = vld [vmem:[%s1524_s1 + $0x20] sm:$0xff]   ;;  %v349_v9 = vld [vmem:[%s1526_s3 + $0x10] sm:$0xff]  ;;  %v348_v10 = vld [vmem:[%s1526_s3 + $0x8] sm:$0xff]  ;;  %39 = vst.msk [vmem:[#allocation2 + $0x8] sm:$0xff] %vm37_vm0, %v1209_v22 }
   0x4   :  { %1075 = vmatprep.subr.bf16.mxu0 %v1184_v2  ;;  %v347_v8 = vld [vmem:[%s1526_s3] sm:$0xff]  ;;  %375 = vperm.xlu1 %1182, %v349_v9   ;;  %v350_v11 = vld [vmem:[%s1526_s3 + $0x18] sm:$0xff]  ;;  %v1189_v12 = vld [vmem:[%s1524_s1 + $0x30] sm:$0xff]   ;;  %41 = vst.msk [vmem:[#allocation2 + $0x18] sm:$0xff] %vm37_vm0, %v1209_v22 }
   0x5   :  { %365 = vperm.xlu0 %1181, %v347_v8   ;;  %v351_v13 = vld [vmem:[%s1526_s3 + $0x20] sm:$0xff]  ;;  %v352_v14 = vld [vmem:[%s1526_s3 + $0x28] sm:$0xff]  ;;  %v1190_v15 = vld [vmem:[%s1524_s1 + $0x38] sm:$0xff]   ;;  %42 = vst.msk [vmem:[#allocation2 + $0x20] sm:$0xff] %vm37_vm0, %v1209_v22 }
   0x6   :  { %v353_v16 = vld [vmem:[%s1526_s3 + $0x30] sm:$0xff]  ;;  %v354_v17 = vld [vmem:[%s1526_s3 + $0x38] sm:$0xff]  ;;  %v1192_v18 = vld [vmem:[%s1525_s0 + $0x8] sm:$0xff]   ;;  %43 = vst.msk [vmem:[#allocation2 + $0x28] sm:$0xff] %vm37_vm0, %v1209_v22 }
   0x7   :  { %1076 = vmatpush3.bf16.msra.mxu0 %v1184_v2  ;;  %v355_v19 = vld [vmem:[%s1526_s3 + $0x40] sm:$0xff]  ;;  %v356_v20 = vld [vmem:[%s1526_s3 + $0x48] sm:$0xff]  ;;  %v1193_v21 = vld [vmem:[%s1525_s0 + $0x10] sm:$0xff]   ;;  %44 = vst.msk [vmem:[#allocation2 + $0x30] sm:$0xff] %vm37_vm0, %v1209_v22 }
   0x8   :  { %1077 = vmatprep.subr.bf16.mxu0 %v1185_v3  ;;  %380 = vperm.xlu1 %1182, %v350_v11   ;;  %45 = vst.msk [vmem:[#allocation2 + $0x38] sm:$0xff] %vm37_vm0, %v1209_v22  ;;  %46 = vst.msk [vmem:[#allocation2 + $0x40] sm:$0xff] %vm37_vm0, %v1209_v22  ;;  %v357_v23 = vld [vmem:[%s1526_s3 + $0x50] sm:$0xff]  ;;  %v358_v24 = vld [vmem:[%s1526_s3 + $0x58] sm:$0xff] }
   0x9   :  { %370 = vperm.xlu0 %1181, %v348_v10   ;;  %47 = vst.msk [vmem:[#allocation2 + $0x48] sm:$0xff] %vm37_vm0, %v1209_v22  ;;  %48 = vst.msk [vmem:[#allocation2 + $0x50] sm:$0xff] %vm37_vm0, %v1209_v22  ;;  %v1194_v25 = vld [vmem:[%s1525_s0 + $0x18] sm:$0xff]   ;;  %v359_v26 = vld [vmem:[%s1526_s3 + $0x60] sm:$0xff] }
   0xa   :  { %49 = vst.msk [vmem:[#allocation2 + $0x58] sm:$0xff] %vm37_vm0, %v1209_v22  ;;  %50 = vst.msk [vmem:[#allocation2 + $0x60] sm:$0xff] %vm37_vm0, %v1209_v22  ;;  %v360_v27 = vld [vmem:[%s1526_s3 + $0x68] sm:$0xff]  ;;  %v1195_v28 = vld [vmem:[%s1525_s0 + $0x20] sm:$0xff]  }
   0xb   :  { %1078 = vmatpush3.bf16.msra.mxu0 %v1185_v3  ;;  %51 = vst.msk [vmem:[#allocation2 + $0x68] sm:$0xff] %vm37_vm0, %v1209_v22  ;;  %52 = vst.msk [vmem:[#allocation2 + $0x70] sm:$0xff] %vm37_vm0, %v1209_v22  ;;  %v361_v29 = vld [vmem:[%s1526_s3 + $0x70] sm:$0xff]  ;;  %v362_v30 = vld [vmem:[%s1526_s3 + $0x78] sm:$0xff] }
   0xc   :  { %1079 = vmatprep.subr.bf16.mxu0 %v1186_v4  ;;  %390 = vperm.xlu1 %1182, %v352_v14   ;;  %53 = vst.msk [vmem:[#allocation2 + $0x78] sm:$0xff] %vm37_vm0, %v1209_v22  ;;  %v1196_v31 = vld [vmem:[%s1525_s0 + $0x28] sm:$0xff]   ;;  %v1197_v32 = vld [vmem:[%s1525_s0 + $0x30] sm:$0xff]   ;;  %v1198_v33 = vld [vmem:[%s1525_s0 + $0x38] sm:$0xff]  }
   0xd   :  { %385 = vperm.xlu0 %1181, %v351_v13   ;;  %v484_v34 = vld [vmem:[%s1527_s5] sm:$0xf]  ;;  %v56_v41 = vld [vmem:[#allocation2 + $0x10] sm:$0xff]  ;;  %v57_v45 = vld [vmem:[#allocation2 + $0x18] sm:$0xff] }
   0xe   :  { %1177 = vmatprep.subr.msk.bf16.mxu1 %vm509_vm1, %v484_v34  ;;  %v511_v35 = vsel %vm509_vm1, %v484_v34, 0  ;;  %v483_v36 = vld [vmem:[%s1528_s4] sm:$0xf]  ;;  %v55_v48 = vld [vmem:[#allocation2 + $0x8] sm:$0xff]  ;;  %v60_v56 = vld [vmem:[#allocation2 + $0x30] sm:$0xff] }
   0xf   :  { %1080 = vmatpush3.bf16.msra.mxu0 %v1186_v4  ;;  %1106 = vmatpush3.bf16.msra.mxu1 %v511_v35  ;;  %v1378_v37 = vsel %vm509_vm1, %v483_v36, 0  ;;  %v1383_v38 = vld [vmem:[%s1530_s7] sm:$0xff]   ;;  %v61_v60 = vld [vmem:[#allocation2 + $0x38] sm:$0xff]  ;;  %v59_v63 = vld [vmem:[#allocation2 + $0x28] sm:$0xff] }
  0x10   :  { %1081 = vmatprep.subr.bf16.mxu0 %v1187_v6  ;;  %400 = vperm.xlu1 %1182, %v354_v17   ;;  %v54_v42 = vld [vmem:[#allocation2] sm:$0xff]  ;;  %v63_v22 = vld [vmem:[#allocation2 + $0x48] sm:$0xff] }
  0x11   :  { %395 = vperm.xlu0 %1181, %v353_v16   ;;  %1178 = vmatprep.subr.msk.bf16.mxu1 %vm509_vm1, %v483_v36  ;;  %v58_v57 = vld [vmem:[#allocation2 + $0x20] sm:$0xff] }
  0x12   :  { %v68_v36 = vld [vmem:[#allocation2 + $0x70] sm:$0xff] }
  0x13   :  { %1082 = vmatpush3.bf16.msra.mxu0 %v1187_v6 }
  0x14   :  { %1083 = vmatprep.subr.bf16.mxu0 %v1188_v7  ;;  %410 = vperm.xlu1 %1182, %v356_v20  }
  0x15   :  { %405 = vperm.xlu0 %1181, %v355_v19  }
  0x17   :  { %1084 = vmatpush3.bf16.msra.mxu0 %v1188_v7 }
  0x18   :  { %1085 = vmatprep.subr.bf16.mxu0 %v1189_v12  ;;  %420 = vperm.xlu1 %1182, %v358_v24  }
  0x19   :  { %415 = vperm.xlu0 %1181, %v357_v23  }
  0x1b   :  { %1086 = vmatpush3.bf16.msra.mxu0 %v1189_v12  ;;  %v64_v12 = vld [vmem:[#allocation2 + $0x50] sm:$0xff] }
  0x1c   :  { %1087 = vmatprep.subr.bf16.mxu0 %v1190_v15  ;;  %430 = vperm.xlu1 %1182, %v360_v27  }
  0x1d   :  { %425 = vperm.xlu0 %1181, %v359_v26  }
  0x1f   :  { %1088 = vmatpush3.bf16.msra.mxu0 %v1190_v15  ;;  %v62_v15 = vld [vmem:[#allocation2 + $0x40] sm:$0xff] }
  0x20   :  { %440 = vperm.xlu1 %1182, %v362_v30   ;;  %1141 = vmatprep.subr.bf16.mxu0 %v1383_v38 }
  0x21   :  { %435 = vperm.xlu0 %1181, %v361_v29  }
  0x22   :  { %1090 = vmatmul.mubr.bf16.vlgmr.msra.gmra.mrb[0].mxu0 %v1192_v18  ;;  %v65_v18 = vld [vmem:[#allocation2 + $0x58] sm:$0xff] }
  0x23   :  { %1093 = vmatprep.mubr.bf16.mxu0 %v1193_v21  ;;  %1142 = vmatpush3.bf16.msra.mxu0 %v1383_v38 }
  0x2a   :  { %1094 = vmatmul.mubr.bf16.gmra.mrb[4].mxu0 %v1194_v25 }
  0x2b   :  { %1097 = vmatprep.mubr.bf16.mxu0 %v1195_v28 }
  0x32   :  { %1098 = vmatmul.mubr.bf16.gmra.mrb[8].mxu0 %v1196_v31 }
  0x33   :  { %1101 = vmatprep.mubr.bf16.mxu0 %v1197_v32 }
  0x3a   :  { %1102 = vmatmul.mubr.bf16.gmra.mrb[12].mxu0 %v1198_v33 }
  0x83   :  { %v376_v39 = vpop.permute.xlu1 %375 }
  0x84   :  { %v366_v40 = vpop.permute.xlu0 %365 }
  0x87   :  { %v381_v43 = vpop.permute.xlu1 %380 }
  0x88   :  { %v371_v49 = vpop.permute.xlu0 %370 }
  0x8b   :  { %v391_v55 = vpop.permute.xlu1 %390 }
  0x8c   :  { %v386_v58 = vpop.permute.xlu0 %385 }
  0x8f   :  { %v401_v5 = vpop.permute.xlu1 %400 }
  0x90   :  { %v396_v11 = vpop.permute.xlu0 %395 }
  0x93   :  { %v411_v24 = vpop.permute.xlu1 %410 }
  0x94   :  { %v406_v30 = vpop.permute.xlu0 %405 }
  0xf5   :  { %v1091_v44 = vpop.f32.mrb[0].mxu0 }
  0xf6   :  { %v297_v46 = vadd.f32 %v1091_v44, %v56_v41  ;;  %v232_v47 = vpop.f32.mrb[1].mxu0  ;;  %v66_v41 = vld [vmem:[#allocation2 + $0x60] sm:$0xff] }
  0xf7   :  { %v295_v50 = vadd.f32 %v232_v47, %v54_v42  ;;  %v1092_v51 = vpop.f32.mrb[2].mxu0 }
  0xf8   :  { %314 = vst.msk [vmem:[#allocation2 + $0x10] sm:$0xff] %vm37_vm0, %v297_v46  ;;  %v298_v52 = vadd.f32 %v1092_v51, %v57_v45  ;;  %v235_v53 = vpop.f32.mrb[3].mxu0  ;;  %v69_v45 = vld [vmem:[#allocation2 + $0x78] sm:$0xff] }
  0xf9   :  { %312 = vst.msk [vmem:[#allocation2] sm:$0xff] %vm37_vm0, %v295_v50  ;;  %v296_v54 = vadd.f32 %v235_v53, %v55_v48  ;;  %v67_v48 = vld [vmem:[#allocation2 + $0x68] sm:$0xff]  ;;  %v416_v50 = vpop.permute.xlu0 %415 }
  0xfa   :  { %315 = vst.msk [vmem:[#allocation2 + $0x18] sm:$0xff] %vm37_vm0, %v298_v52 }
  0xfb   :  { %313 = vst.msk [vmem:[#allocation2 + $0x8] sm:$0xff] %vm37_vm0, %v296_v54 }
  0xfd   :  { %v1095_v59 = vpop.f32.mrb[4].mxu0 }
  0xfe   :  { %v301_v61 = vadd.f32 %v1095_v59, %v60_v56  ;;  %v248_v62 = vpop.f32.mrb[5].mxu0 }
  0xff   :  { %v299_v0 = vadd.f32 %v248_v62, %v58_v57  ;;  %v1096_v1 = vpop.f32.mrb[6].mxu0  ;;  %v333_v7 = vld [vmem:[#allocation2 + $0x10] sm:$0xff] }
 0x100   :  { %318 = vst.msk [vmem:[#allocation2 + $0x30] sm:$0xff] %vm37_vm0, %v301_v61  ;;  %v302_v2 = vadd.f32 %v1096_v1, %v61_v60  ;;  %v251_v3 = vpop.f32.mrb[7].mxu0  ;;  %v331_v4 = vld [vmem:[#allocation2] sm:$0xff]  ;;  %v445_v16 = vmul.f32 %v376_v39, %v333_v7  ;;  %v426_v1 = vpop.permute.xlu0 %425 }
 0x101   :  { %316 = vst.msk [vmem:[#allocation2 + $0x20] sm:$0xff] %vm37_vm0, %v299_v0  ;;  %v300_v6 = vadd.f32 %v251_v3, %v59_v63  ;;  %v334_v8 = vld [vmem:[#allocation2 + $0x18] sm:$0xff]  ;;  %v443_v13 = vmul.f32 %v366_v40, %v331_v4 }
 0x102   :  { %319 = vst.msk [vmem:[#allocation2 + $0x38] sm:$0xff] %vm37_vm0, %v302_v2  ;;  %v332_v9 = vld [vmem:[#allocation2 + $0x8] sm:$0xff]  ;;  %v446_v10 = vmul.f32 %v381_v43, %v334_v8  ;;  %v421_v43 = vpop.permute.xlu1 %420 }
 0x103   :  { %317 = vst.msk [vmem:[#allocation2 + $0x28] sm:$0xff] %vm37_vm0, %v300_v6  ;;  %v444_v14 = vmul.f32 %v371_v49, %v332_v9 }
 0x104   :  { %v460_v23 = vpack.c.bf16 %v446_v10, %v445_v16  ;;  %v436_v10 = vpop.permute.xlu0 %435 }
 0x105   :  { %v1099_v17 = vpop.f32.mrb[8].mxu0  ;;  %v459_v19 = vpack.c.bf16 %v444_v14, %v443_v13 }
 0x106   :  { %v305_v20 = vadd.f32 %v1099_v17, %v64_v12  ;;  %v264_v21 = vpop.f32.mrb[9].mxu0  ;;  %v431_v61 = vpop.permute.xlu1 %430  ;;  %v1200_v17 = vld [vmem:[%s1529_s2 + $0x8] sm:$0xff]  }
 0x107   :  { %v303_v25 = vadd.f32 %v264_v21, %v62_v15  ;;  %v1100_v26 = vpop.f32.mrb[10].mxu0  ;;  %1107 = vmatprep.mubr.msk.bf16.mxu1 %vm37_vm0, %v459_v19  ;;  %v337_v32 = vld [vmem:[#allocation2 + $0x30] sm:$0xff]  ;;  %v1199_v15 = vld [vmem:[%s1529_s2] sm:$0xff]   ;;  %v1202_v19 = vld [vmem:[%s1529_s2 + $0x18] sm:$0xff]  }
 0x108   :  { %322 = vst.msk [vmem:[#allocation2 + $0x50] sm:$0xff] %vm37_vm0, %v305_v20  ;;  %v306_v27 = vadd.f32 %v1100_v26, %v65_v18  ;;  %v267_v28 = vpop.f32.mrb[11].mxu0  ;;  %1108 = vmatmul.mubr.msk.bf16.vlgmr.msra.gmra.mrb[0].mxu1 %vm37_vm0, %v460_v23  ;;  %v335_v29 = vld [vmem:[#allocation2 + $0x20] sm:$0xff]  ;;  %v449_v42 = vmul.f32 %v396_v11, %v337_v32  ;;  %v1201_v18 = vld [vmem:[%s1529_s2 + $0x10] sm:$0xff]   ;;  %v1204_v21 = vld [vmem:[%s1529_s2 + $0x28] sm:$0xff]  }
 0x109   :  { %320 = vst.msk [vmem:[#allocation2 + $0x40] sm:$0xff] %vm37_vm0, %v303_v25  ;;  %v304_v31 = vadd.f32 %v267_v28, %v63_v22  ;;  %1124 = vmatpush3.bf16.msra.mxu1 %v1378_v37  ;;  %v338_v33 = vld [vmem:[#allocation2 + $0x38] sm:$0xff]  ;;  %v447_v39 = vmul.f32 %v386_v58, %v335_v29  ;;  %v1203_v20 = vld [vmem:[%s1529_s2 + $0x20] sm:$0xff]  }
 0x10a   :  { %323 = vst.msk [vmem:[#allocation2 + $0x58] sm:$0xff] %vm37_vm0, %v306_v27  ;;  %v336_v34 = vld [vmem:[#allocation2 + $0x28] sm:$0xff]  ;;  %v450_v35 = vmul.f32 %v401_v5, %v338_v33  ;;  %1159 = vmatprep.subr.bf16.mxu1 %v1383_v38  ;;  %v441_v5 = vpop.permute.xlu1 %440  ;;  %v1206_v22 = vld [vmem:[%s1529_s2 + $0x38] sm:$0xff]   ;;  %v1019_v23 = vld [vmem:[%s1531_s6] ss:$0 sm:$0xff] }
 0x10b   :  { %321 = vst.msk [vmem:[#allocation2 + $0x48] sm:$0xff] %vm37_vm0, %v304_v31  ;;  %v448_v40 = vmul.f32 %v391_v55, %v336_v34 }
 0x10c   :  { %v462_v49 = vpack.c.bf16 %v450_v35, %v449_v42 }
 0x10d   :  { %v1103_v44 = vpop.f32.mrb[12].mxu0  ;;  %v461_v46 = vpack.c.bf16 %v448_v40, %v447_v39 }
 0x10e   :  { %v309_v37 = vadd.f32 %v1103_v44, %v68_v36  ;;  %v280_v47 = vpop.f32.mrb[13].mxu0 }
 0x10f   :  { %v307_v51 = vadd.f32 %v280_v47, %v66_v41  ;;  %v1104_v52 = vpop.f32.mrb[14].mxu0  ;;  %1111 = vmatprep.mubr.msk.bf16.mxu1 %vm37_vm0, %v461_v46  ;;  %v341_v57 = vld [vmem:[#allocation2 + $0x50] sm:$0xff] }
 0x110   :  { %326 = vst.msk [vmem:[#allocation2 + $0x70] sm:$0xff] %vm37_vm0, %v309_v37  ;;  %v310_v53 = vadd.f32 %v1104_v52, %v69_v45  ;;  %v283_v54 = vpop.f32.mrb[15].mxu0  ;;  %1112 = vmatmul.mubr.msk.bf16.gmra.mrb[4].mxu1 %vm37_vm0, %v462_v49  ;;  %v339_v55 = vld [vmem:[#allocation2 + $0x40] sm:$0xff]  ;;  %v453_v0 = vmul.f32 %v416_v50, %v341_v57 }
 0x111   :  { %324 = vst.msk [vmem:[#allocation2 + $0x60] sm:$0xff] %vm37_vm0, %v307_v51  ;;  %v308_v56 = vadd.f32 %v283_v54, %v67_v48  ;;  %v342_v58 = vld [vmem:[#allocation2 + $0x58] sm:$0xff]  ;;  %v451_v62 = vmul.f32 %v406_v30, %v339_v55 }
 0x112   :  { %327 = vst.msk [vmem:[#allocation2 + $0x78] sm:$0xff] %vm37_vm0, %v310_v53  ;;  %v340_v59 = vld [vmem:[#allocation2 + $0x48] sm:$0xff]  ;;  %v454_v60 = vmul.f32 %v421_v43, %v342_v58 }
 0x113   :  { %325 = vst.msk [vmem:[#allocation2 + $0x68] sm:$0xff] %vm37_vm0, %v308_v56  ;;  %v452_v63 = vmul.f32 %v411_v24, %v340_v59 }
 0x114   :  { %v464_v3 = vpack.c.bf16 %v454_v60, %v453_v0 }
 0x115   :  { %v463_v2 = vpack.c.bf16 %v452_v63, %v451_v62 }
 0x117   :  { %1115 = vmatprep.mubr.msk.bf16.mxu1 %vm37_vm0, %v463_v2  ;;  %v345_v6 = vld [vmem:[#allocation2 + $0x70] sm:$0xff] }
 0x118   :  { %1116 = vmatmul.mubr.msk.bf16.gmra.mrb[8].mxu1 %vm37_vm0, %v464_v3  ;;  %v343_v4 = vld [vmem:[#allocation2 + $0x60] sm:$0xff]  ;;  %v457_v13 = vmul.f32 %v436_v10, %v345_v6 }
 0x119   :  { %v346_v7 = vld [vmem:[#allocation2 + $0x78] sm:$0xff]  ;;  %v455_v11 = vmul.f32 %v426_v1, %v343_v4 }
 0x11a   :  { %v344_v8 = vld [vmem:[#allocation2 + $0x68] sm:$0xff]  ;;  %v458_v9 = vmul.f32 %v441_v5, %v346_v7 }
 0x11b   :  { %v456_v12 = vmul.f32 %v431_v61, %v344_v8 }
 0x11c   :  { %v466_v16 = vpack.c.bf16 %v458_v9, %v457_v13 }
 0x11d   :  { %v465_v14 = vpack.c.bf16 %v456_v12, %v455_v11 }
 0x11f   :  { %1119 = vmatprep.mubr.msk.bf16.mxu1 %vm37_vm0, %v465_v14 }
 0x120   :  { %1120 = vmatmul.mubr.msk.bf16.gmra.mrb[12].mxu1 %vm37_vm0, %v466_v16 }
 0x121   :  { %1125 = vmatprep.mubr.msk.bf16.mxu1 %vm37_vm0, %v1199_v15 }
 0x128   :  { %1126 = vmatmul.mubr.msk.bf16.vlgmr.msra.gmra.mrb[0].mxu1 %vm37_vm0, %v1200_v17  ;;  %v1020_v17 = vld [vmem:[%s1532_s8] ss:$0 sm:$0xff] }
 0x129   :  { %1129 = vmatprep.mubr.msk.bf16.mxu1 %vm37_vm0, %v1201_v18  ;;  %1160 = vmatpush3.bf16.msra.mxu1 %v1383_v38  ;;  %v1205_v38 = vld [vmem:[%s1529_s2 + $0x30] sm:$0xff]  }
 0x130   :  { %1130 = vmatmul.mubr.msk.bf16.gmra.mrb[4].mxu1 %vm37_vm0, %v1202_v19 }
 0x131   :  { %1133 = vmatprep.mubr.msk.bf16.mxu1 %vm37_vm0, %v1203_v20 }
 0x138   :  { %1134 = vmatmul.mubr.msk.bf16.gmra.mrb[8].mxu1 %vm37_vm0, %v1204_v21 }
 0x139   :  { %1137 = vmatprep.mubr.msk.bf16.mxu1 %vm37_vm0, %v1205_v38 }
 0x140   :  { %1138 = vmatmul.mubr.msk.bf16.gmra.mrb[12].mxu1 %vm37_vm0, %v1206_v22 }
 0x1fb   :  { %v1127_v24 = vpop.f32.mrb[0].mxu1 }
 0x1fc   :  { %v783_v25 = vadd.f32 %v1127_v24, %v1019_v23  ;;  %v711_v26 = vpop.f32.mrb[1].mxu1 }
 0x1fd   :  { %v781_v27 = vadd.f32 %v1019_v23, %v711_v26  ;;  %v1128_v28 = vpop.f32.mrb[2].mxu1 }
 0x1fe   :  { %v784_v29 = vadd.f32 %v1128_v28, %v1019_v23  ;;  %v714_v30 = vpop.f32.mrb[3].mxu1  ;;  %v799_v32 = vmax.f32 %v783_v25, 0.0 }
 0x1ff   :  { %v782_v31 = vadd.f32 %v1019_v23, %v714_v30  ;;  %v797_v34 = vmax.f32 %v781_v27, 0.0 }
 0x200   :  { %v800_v33 = vmax.f32 %v784_v29, 0.0 }
 0x201   :  { %v798_v35 = vmax.f32 %v782_v31, 0.0 }
 0x202   :  { %v814_v36 = vpack.c.bf16 %v800_v33, %v799_v32 }
 0x203   :  { %v813_v39 = vpack.c.bf16 %v798_v35, %v797_v34  ;;  %v1131_v40 = vpop.f32.mrb[4].mxu1 }
 0x204   :  { %v787_v41 = vadd.f32 %v1131_v40, %v1019_v23  ;;  %v727_v42 = vpop.f32.mrb[5].mxu1 }
 0x205   :  { %v785_v43 = vadd.f32 %v1019_v23, %v727_v42  ;;  %v1132_v44 = vpop.f32.mrb[6].mxu1  ;;  %1143 = vmatprep.mubr.msk.bf16.mxu0 %vm836_vm2, %v813_v39 }
 0x206   :  { %v788_v45 = vadd.f32 %v1132_v44, %v1019_v23  ;;  %v730_v46 = vpop.f32.mrb[7].mxu1  ;;  %1144 = vmatmul.mubr.msk.bf16.vlgmr.msra.gmra.mrb[16].mxu0 %vm836_vm2, %v814_v36  ;;  %v803_v47 = vmax.f32 %v787_v41, 0.0 }
 0x207   :  { %v786_v37 = vadd.f32 %v1019_v23, %v730_v46  ;;  %v801_v49 = vmax.f32 %v785_v43, 0.0 }
 0x208   :  { %v804_v48 = vmax.f32 %v788_v45, 0.0 }
 0x209   :  { %v802_v50 = vmax.f32 %v786_v37, 0.0 }
 0x20a   :  { %v816_v51 = vpack.c.bf16 %v804_v48, %v803_v47 }
 0x20b   :  { %v815_v52 = vpack.c.bf16 %v802_v50, %v801_v49  ;;  %v1135_v53 = vpop.f32.mrb[8].mxu1 }
 0x20c   :  { %v791_v54 = vadd.f32 %v1135_v53, %v1019_v23  ;;  %v743_v55 = vpop.f32.mrb[9].mxu1 }
 0x20d   :  { %v789_v56 = vadd.f32 %v1019_v23, %v743_v55  ;;  %v1136_v57 = vpop.f32.mrb[10].mxu1  ;;  %1147 = vmatprep.mubr.msk.bf16.mxu0 %vm836_vm2, %v815_v52 }
 0x20e   :  { %v792_v58 = vadd.f32 %v1136_v57, %v1019_v23  ;;  %v746_v59 = vpop.f32.mrb[11].mxu1  ;;  %1148 = vmatmul.mubr.msk.bf16.gmra.mrb[20].mxu0 %vm836_vm2, %v816_v51  ;;  %v807_v61 = vmax.f32 %v791_v54, 0.0 }
 0x20f   :  { %v790_v60 = vadd.f32 %v1019_v23, %v746_v59  ;;  %v805_v63 = vmax.f32 %v789_v56, 0.0 }
 0x210   :  { %v808_v62 = vmax.f32 %v792_v58, 0.0 }
 0x211   :  { %v806_v0 = vmax.f32 %v790_v60, 0.0 }
 0x212   :  { %v818_v1 = vpack.c.bf16 %v808_v62, %v807_v61 }
 0x213   :  { %v817_v2 = vpack.c.bf16 %v806_v0, %v805_v63  ;;  %v1139_v3 = vpop.f32.mrb[12].mxu1 }
 0x214   :  { %v795_v4 = vadd.f32 %v1139_v3, %v1019_v23  ;;  %v759_v5 = vpop.f32.mrb[13].mxu1 }
 0x215   :  { %v793_v6 = vadd.f32 %v1019_v23, %v759_v5  ;;  %v1140_v7 = vpop.f32.mrb[14].mxu1  ;;  %1151 = vmatprep.mubr.msk.bf16.mxu0 %vm836_vm2, %v817_v2 }
 0x216   :  { %v796_v8 = vadd.f32 %v1140_v7, %v1019_v23  ;;  %v762_v9 = vpop.f32.mrb[15].mxu1  ;;  %1152 = vmatmul.mubr.msk.bf16.gmra.mrb[24].mxu0 %vm836_vm2, %v818_v1  ;;  %v811_v11 = vmax.f32 %v795_v4, 0.0 }
 0x217   :  { %v794_v10 = vadd.f32 %v1019_v23, %v762_v9  ;;  %v809_v13 = vmax.f32 %v793_v6, 0.0 }
 0x218   :  { %v812_v12 = vmax.f32 %v796_v8, 0.0 }
 0x219   :  { %v810_v14 = vmax.f32 %v794_v10, 0.0 }
 0x21a   :  { %v820_v15 = vpack.c.bf16 %v812_v12, %v811_v11 }
 0x21b   :  { %v819_v16 = vpack.c.bf16 %v810_v14, %v809_v13 }
 0x21d   :  { %1155 = vmatprep.mubr.msk.bf16.mxu1 %vm836_vm2, %v819_v16 }
 0x21e   :  { %1156 = vmatmul.mubr.msk.bf16.vlgmr.msra.gmra.mrb[16].mxu1 %vm836_vm2, %v820_v15 }
 0x2d9   :  { %v1145_v18 = vpop.f32.mrb[16].mxu0 }
 0x2da   :  { %v904_v19 = vadd.f32 %v1145_v18, %v1020_v17  ;;  %v895_v20 = vpop.f32.mrb[17].mxu0 }
 0x2db   :  { %v896_v21 = vadd.f32 %v1020_v17, %v895_v20  ;;  %v1146_v38 = vpop.f32.mrb[18].mxu0 }
 0x2dc   :  { %961 = vst.msk [vmem:[%s1533_s9 + $0x10] sm:$0xff] %vm958_vm3, %v904_v19  ;;  %v907_v22 = vadd.f32 %v1146_v38, %v1020_v17  ;;  %v898_v23 = vpop.f32.mrb[19].mxu0 }
 0x2dd   :  { %959 = vst.msk [vmem:[%s1533_s9] sm:$0xff] %vm958_vm3, %v896_v21  ;;  %v899_v24 = vadd.f32 %v1020_v17, %v898_v23 }
 0x2de   :  { %962 = vst.msk [vmem:[%s1533_s9 + $0x18] sm:$0xff] %vm958_vm3, %v907_v22 }
 0x2df   :  { %960 = vst.msk [vmem:[%s1533_s9 + $0x8] sm:$0xff] %vm958_vm3, %v899_v24 }
 0x2e1   :  { %v1149_v25 = vpop.f32.mrb[20].mxu0 }
 0x2e2   :  { %v920_v26 = vadd.f32 %v1149_v25, %v1020_v17  ;;  %v911_v27 = vpop.f32.mrb[21].mxu0 }
 0x2e3   :  { %v912_v28 = vadd.f32 %v1020_v17, %v911_v27  ;;  %v1150_v29 = vpop.f32.mrb[22].mxu0 }
 0x2e4   :  { %965 = vst.msk [vmem:[%s1533_s9 + $0x30] sm:$0xff] %vm958_vm3, %v920_v26  ;;  %v923_v30 = vadd.f32 %v1150_v29, %v1020_v17  ;;  %v914_v31 = vpop.f32.mrb[23].mxu0 }
 0x2e5   :  { %963 = vst.msk [vmem:[%s1533_s9 + $0x20] sm:$0xff] %vm958_vm3, %v912_v28  ;;  %v915_v32 = vadd.f32 %v1020_v17, %v914_v31 }
 0x2e6   :  { %966 = vst.msk [vmem:[%s1533_s9 + $0x38] sm:$0xff] %vm958_vm3, %v923_v30 }
 0x2e7   :  { %964 = vst.msk [vmem:[%s1533_s9 + $0x28] sm:$0xff] %vm958_vm3, %v915_v32 }
 0x2e9   :  { %v1153_v33 = vpop.f32.mrb[24].mxu0 }
 0x2ea   :  { %v936_v34 = vadd.f32 %v1153_v33, %v1020_v17  ;;  %v927_v35 = vpop.f32.mrb[25].mxu0 }
 0x2eb   :  { %v928_v36 = vadd.f32 %v1020_v17, %v927_v35  ;;  %v1154_v39 = vpop.f32.mrb[26].mxu0 }
 0x2ec   :  { %969 = vst.msk [vmem:[%s1533_s9 + $0x50] sm:$0xff] %vm958_vm3, %v936_v34  ;;  %v939_v40 = vadd.f32 %v1154_v39, %v1020_v17  ;;  %v930_v41 = vpop.f32.mrb[27].mxu0 }
 0x2ed   :  { %967 = vst.msk [vmem:[%s1533_s9 + $0x40] sm:$0xff] %vm958_vm3, %v928_v36  ;;  %v931_v42 = vadd.f32 %v1020_v17, %v930_v41 }
 0x2ee   :  { %970 = vst.msk [vmem:[%s1533_s9 + $0x58] sm:$0xff] %vm958_vm3, %v939_v40 }
 0x2ef   :  { %968 = vst.msk [vmem:[%s1533_s9 + $0x48] sm:$0xff] %vm958_vm3, %v931_v42 }
 0x2f1   :  { %v1157_v43 = vpop.f32.mrb[16].mxu1 }
 0x2f2   :  { %v952_v44 = vadd.f32 %v1157_v43, %v1020_v17  ;;  %v943_v45 = vpop.f32.mrb[17].mxu1 }
 0x2f3   :  { %v944_v46 = vadd.f32 %v1020_v17, %v943_v45  ;;  %v1158_v37 = vpop.f32.mrb[18].mxu1 }
 0x2f4   :  { %973 = vst.msk [vmem:[%s1533_s9 + $0x70] sm:$0xff] %vm958_vm3, %v952_v44  ;;  %v955_v47 = vadd.f32 %v1158_v37, %v1020_v17  ;;  %v946_v48 = vpop.f32.mrb[19].mxu1 }
 0x2f5   :  { %971 = vst.msk [vmem:[%s1533_s9 + $0x60] sm:$0xff] %vm958_vm3, %v944_v46  ;;  %v947_v49 = vadd.f32 %v1020_v17, %v946_v48 }
 0x2f6   :  { %974 = vst.msk [vmem:[%s1533_s9 + $0x78] sm:$0xff] %vm958_vm3, %v955_v47 }
 0x2f7   :  { %972 = vst.msk [vmem:[%s1533_s9 + $0x68] sm:$0xff] %vm958_vm3, %v947_v49 }

</bundles_post_ra>
